<compile_context>
chip_gen: v5e
topology: v5e:2x2
jax: 0.10.0
libtpu: 0.0.40
codegen_flags: <defaults>
</compile_context>

<pallas_src>
import functools

import jax
import jax.numpy as jnp
from jax.experimental import pallas as pl
from jax.experimental.pallas import tpu as pltpu


_NEG_BIG = -1e30  # finite "-inf" (exp(_NEG_BIG - m) underflows to exactly 0.0 in f32)


def _round_up(n: int, m: int) -> int:
    return ((n + m - 1) // m) * m


def _tpu_generation_defaults():
    """Returns (default sequence tile, VMEM scoped-budget cap in bytes)."""
    try:
        kind = jax.devices()[0].device_kind.lower()
    except Exception:  # pragma: no cover
        kind = ""
    if "v7" in kind:
        # v7x: 64 MiB VMEM per TensorCore -> smaller tiles + budget headroom.
        return 256, 48 * 2 ** 20
    if "v5" in kind or "v6" in kind:
        # v5e/v6e: 128 MiB VMEM -> larger tiles, generous scoped budget.
        return 512, 100 * 2 ** 20
    return 256, 64 * 2 ** 20  # unknown / older generations: conservative.


# --------------------------------------------------------------------------- #
# Pass 1: fused QKV projection (once per token, hoisted out of the kv loop).  #
# --------------------------------------------------------------------------- #
def _qkv_proj_kernel(x_ref, w_ref, b_ref, q_ref, k_ref, v_ref, *, h_pad: int):
    x = x_ref[0]                                                   # (T, E_pad) bf16
    y = jnp.dot(x, w_ref[...], preferred_element_type=jnp.float32)  # (T, 3*H_pad) f32
    y = (y + b_ref[...]).astype(q_ref.dtype)                        # bf16
    # Static, 128-aligned lane slices split the fused projection into q / k / v.
    q_ref[0] = y[:, :h_pad]
    k_ref[0] = y[:, h_pad:2 * h_pad]
    v_ref[0] = y[:, 2 * h_pad:]


# --------------------------------------------------------------------------- #
# Pass 2: flash attention over precomputed Q / K / V tiles.                   #
# --------------------------------------------------------------------------- #
def _flash_attn_kernel(q_ref, k_ref, v_ref, o_ref, m_sc, l_sc, acc_sc,
                       *, mask: bool, mask_kv: bool, seq_len: int):
    iq = pl.program_id(1)
    ik = pl.program_id(2)

    # ---- per-(b, q-block) init: reset online-softmax state -------------------
    @pl.when(ik == 0)
    def _():
        m_sc[...] = jnp.full(m_sc.shape, -jnp.inf, dtype=m_sc.dtype)
        l_sc[...] = jnp.zeros(l_sc.shape, dtype=l_sc.dtype)
        acc_sc[...] = jnp.zeros(acc_sc.shape, dtype=acc_sc.dtype)

    def compute():
        q = q_ref[0]                                               # (Tq, H) bf16
        k = k_ref[0]                                               # (Tk, H) bf16
        v = v_ref[0]                                               # (Tk, H) bf16

        # scores = q @ k^T without an explicit transpose (contract last dims).
        scores = jax.lax.dot_general(
            q, k, (((1,), (1,)), ((), ())),
            preferred_element_type=jnp.float32)                    # (Tq, Tk) f32

        # per-tile masking (kv padding + reference's lower-triangle mask)
        if mask or mask_kv:
            tq, tk = scores.shape
            col = ik * tk + jax.lax.broadcasted_iota(jnp.int32, (tq, tk), 1)
            if mask:
                row = iq * tq + jax.lax.broadcasted_iota(jnp.int32, (tq, tk), 0)
                keep = col > row                   # reference masks col <= row
                if mask_kv:
                    keep = jnp.logical_and(keep, col < seq_len)
            else:
                keep = col < seq_len
            scores = jnp.where(keep, scores, _NEG_BIG)

        # ---- online softmax update (f32) -------------------------------------
        m_prev = m_sc[...]                                         # (Tq, 1)
        m_new = jnp.maximum(m_prev, jnp.max(scores, axis=-1, keepdims=True))
        alpha = jnp.exp(m_prev - m_new)
        p = jnp.exp(scores - m_new)                                # (Tq, Tk)
        l_sc[...] = alpha * l_sc[...] + jnp.sum(p, axis=-1, keepdims=True)
        acc_sc[...] = alpha * acc_sc[...] + jnp.dot(
            p.astype(v.dtype), v, preferred_element_type=jnp.float32)
        m_sc[...] = m_new

    if mask:
        # Anti-causal keep (col > row): every tile with ik < iq is fully masked,
        # so skip its scores / exp / matmuls / accumulator update entirely.
        pl.when(ik >= iq)(compute)
    else:
        compute()

    # ---- finalize: deferred normalization on the (Tq, H) result --------------
    @pl.when(ik == pl.num_programs(2) - 1)
    def _():
        inv = pl.reciprocal(l_sc[...], approx=True)
        o_ref[0] = (acc_sc[...] * inv).astype(o_ref.dtype)


# --------------------------------------------------------------------------- #
# Wrapper                                                                     #
# --------------------------------------------------------------------------- #
def attention(x, wq, bq, wk, bk, wv, bv, *, mask: bool = False, block_seq=None):
    """x: (B, S, E); wq/wk/wv: (E, H) (pre-transposed Linear weights); b*: (H,).

    Returns (B, S, H), matching the PyTorch module's forward (no score scaling).
    """
    B, S, E = x.shape
    E2, H = wq.shape
    assert E2 == E, "weight shape mismatch"
    out_dtype = x.dtype
    out_isize = jnp.dtype(out_dtype).itemsize

    t_default, vmem_cap = _tpu_generation_defaults()
    if block_seq is None:
        block_seq = t_default

    # Lane-dense padding of the contraction / head dims; sequence tile is a
    # multiple of 16 (bf16 sublane packing) and divides the padded sequence.
    E_pad = _round_up(E, 128)
    H_pad = _round_up(H, 128)
    T = min(block_seq, _round_up(S, 16))
    S_pad = _round_up(S, T)
    n_blocks = S_pad // T

    # bf16 activations: halves the dominant HBM stream and VMEM footprint.
    xp = jnp.pad(x, ((0, 0), (0, S_pad - S), (0, E_pad - E))).astype(jnp.bfloat16)

    def pad_w(w):
        return jnp.pad(w, ((0, E_pad - E), (0, H_pad - H)))

    def pad_b(b):
        return jnp.pad(b, (0, H_pad - H))

    # Fused QKV weight/bias: one (T, 3*H_pad) matmul keeps the MXU N-dim full.
    w_qkv = jnp.concatenate([pad_w(wq), pad_w(wk), pad_w(wv)],
                            axis=1).astype(jnp.bfloat16)            # (E_pad, 3*H_pad)
    b_qkv = jnp.concatenate([pad_b(bq), pad_b(bk), pad_b(bv)]
                            ).reshape(1, 3 * H_pad).astype(jnp.float32)

    # ----------------------------- projection pass ---------------------------
    proj_est = (2 * T * E_pad * 2             # x tile, double-buffered, bf16
                + 2 * E_pad * 3 * H_pad * 2   # fused weight, double-buffered, bf16
                + 2 * 8 * 3 * H_pad * 4       # bias (sublane padded)
                + 6 * T * H_pad * 2           # q/k/v out tiles, double-buffered
                + 2 * T * 3 * H_pad * 4)      # f32 temporaries headroom
    proj_vmem = int(min(vmem_cap, max(2 * proj_est, 32 * 2 ** 20)))
    proj_cost = pl.CostEstimate(
        flops=int(2 * B * S_pad * E_pad * 3 * H_pad),
        transcendentals=0,
        bytes_accessed=int(B * S_pad * E_pad * 2 + E_pad * 3 * H_pad * 2
                           + 3 * B * S_pad * H_pad * 2))

    qkv_shape = jax.ShapeDtypeStruct((B, S_pad, H_pad), jnp.bfloat16)
    q, k, v = pl.pallas_call(
        functools.partial(_qkv_proj_kernel, h_pad=H_pad),
        out_shape=(qkv_shape, qkv_shape, qkv_shape),
        grid_spec=pltpu.PrefetchScalarGridSpec(
            num_scalar_prefetch=0,
            grid=(B, n_blocks),
            in_specs=[
                pl.BlockSpec((1, T, E_pad), lambda b, i: (b, i, 0)),      # x tile
                pl.BlockSpec((E_pad, 3 * H_pad), lambda b, i: (0, 0)),    # W_qkv
                pl.BlockSpec((1, 3 * H_pad), lambda b, i: (0, 0)),        # b_qkv
            ],
            out_specs=[
                pl.BlockSpec((1, T, H_pad), lambda b, i: (b, i, 0)),      # q
                pl.BlockSpec((1, T, H_pad), lambda b, i: (b, i, 0)),      # k
                pl.BlockSpec((1, T, H_pad), lambda b, i: (b, i, 0)),      # v
            ],
        ),
        compiler_params=pltpu.CompilerParams(
            dimension_semantics=("parallel", "parallel"),
            vmem_limit_bytes=proj_vmem),
        cost_estimate=proj_cost,
    )(xp, w_qkv, b_qkv)

    # ------------------------------ flash pass --------------------------------
    flash_est = (6 * T * H_pad * 2            # q/k/v input tiles, double-buffered
                 + 2 * T * H_pad * out_isize  # output tile, double-buffered
                 + 2 * T * 128 * 4            # m, l scratch (lane-padded)
                 + T * H_pad * 4              # acc scratch
                 + 4 * T * T * 4)             # scores / exp temporaries headroom
    flash_vmem = int(min(vmem_cap, max(2 * flash_est, 32 * 2 ** 20)))
    work_frac = 2 if mask else 1
    flash_cost = pl.CostEstimate(
        flops=int(4 * B * S_pad * S_pad * H_pad // work_frac),
        transcendentals=int(B * S_pad * S_pad // work_frac),
        bytes_accessed=int(B * S_pad * H_pad * 2 * (1 + 2 * n_blocks)
                           + B * S_pad * H_pad * out_isize))

    kernel = functools.partial(_flash_attn_kernel, mask=mask,
                               mask_kv=(S_pad != S), seq_len=S)

    # NOTE(v7x): megacore shards along the "parallel" axes; B * n_blocks >= 2
    # keeps both TensorCores busy (true for any non-trivial batch / sequence).
    out = pl.pallas_call(
        kernel,
        out_shape=jax.ShapeDtypeStruct((B, S_pad, H_pad), out_dtype),
        grid_spec=pltpu.PrefetchScalarGridSpec(
            num_scalar_prefetch=0,
            grid=(B, n_blocks, n_blocks),
            in_specs=[
                pl.BlockSpec((1, T, H_pad), lambda b, i, kv: (b, i, 0)),   # q tile
                pl.BlockSpec((1, T, H_pad), lambda b, i, kv: (b, kv, 0)),  # k tile
                pl.BlockSpec((1, T, H_pad), lambda b, i, kv: (b, kv, 0)),  # v tile
            ],
            out_specs=pl.BlockSpec((1, T, H_pad), lambda b, i, kv: (b, i, 0)),
            scratch_shapes=[
                pltpu.VMEM((T, 1), jnp.float32),       # running max m
                pltpu.VMEM((T, 1), jnp.float32),       # running denom l
                pltpu.VMEM((T, H_pad), jnp.float32),   # output accumulator
            ],
        ),
        compiler_params=pltpu.CompilerParams(
            dimension_semantics=("parallel", "parallel", "arbitrary"),
            vmem_limit_bytes=flash_vmem),
        cost_estimate=flash_cost,
    )(q, k, v)

    return out[:, :S, :H]


def _reference(x, wq, bq, wk, bk, wv, bv, mask=False):
    # Pure-JAX reference mirroring the PyTorch forward (f32 throughout).
    q = jnp.einsum("bse,eh->bsh", x, wq) + bq
    k = jnp.einsum("bse,eh->bsh", x, wk) + bk
    v = jnp.einsum("bse,eh->bsh", x, wv) + bv
    scores = jnp.einsum("bqh,bkh->bqk", q, k)
    if mask:
        s = scores.shape[-1]
        tril = jnp.tril(jnp.ones((s, s), dtype=bool))
        scores = jnp.where(tril, -jnp.inf, scores)
    w = jax.nn.softmax(scores, axis=-1)
    return jnp.einsum("bqk,bkh->bqh", w, v)


if __name__ == "__main__":
    B, S, E, H = 2, 8, 32, 16

    key = jax.random.PRNGKey(0)
    kx, kwq, kbq, kwk, kbk, kwv, kbv = jax.random.split(key, 7)

    x = jax.random.normal(kx, (B, S, E), dtype=jnp.float32)

    # nn.Linear(embed_dim, head_dim): weight (H, E), bias (H); init ~ U(-1/sqrt(E), 1/sqrt(E)).
    # Weights are stored pre-transposed to (E, H) so the kernel does x @ W.
    bound = 1.0 / (E ** 0.5)
    wq = jax.random.uniform(kwq, (E, H), jnp.float32, -bound, bound)
    wk = jax.random.uniform(kwk, (E, H), jnp.float32, -bound, bound)
    wv = jax.random.uniform(kwv, (E, H), jnp.float32, -bound, bound)
    bq = jax.random.uniform(kbq, (H,), jnp.float32, -bound, bound)
    bk = jax.random.uniform(kbk, (H,), jnp.float32, -bound, bound)
    bv = jax.random.uniform(kbv, (H,), jnp.float32, -bound, bound)

    # mask=False path (bf16 MXU inputs -> compare to f32 reference with bf16 tolerance)
    out = attention(x, wq, bq, wk, bk, wv, bv, mask=False)
    out = jax.block_until_ready(out)
    ref = _reference(x, wq, bq, wk, bk, wv, bv, mask=False)
    assert out.shape == (B, S, H)
    assert jnp.allclose(out, ref, atol=5e-2, rtol=5e-2), "mismatch vs reference (mask=False)"

    # mask=True path: identical to the -inf reference on every row that has at least
    # one unmasked column; the fully-masked last row is NaN in the reference, skip it.
    out_m = attention(x, wq, bq, wk, bk, wv, bv, mask=True)
    out_m = jax.block_until_ready(out_m)
    ref_m = _reference(x, wq, bq, wk, bk, wv, bv, mask=True)
    assert jnp.allclose(out_m[:, :S - 1], ref_m[:, :S - 1], atol=5e-2, rtol=5e-2), \
        "mismatch vs reference (mask=True)"

    print("KERNEL_OK")
</pallas_src>

<mosaic_0001>
module attributes {stable_mosaic.version = 11 : i64} {
  func.func @_qkv_proj_kernel(%arg0: i32, %arg1: i32, %arg2: memref<1x16x128xbf16, #tpu.memory_space<vmem>>, %arg3: memref<128x384xbf16, #tpu.memory_space<vmem>>, %arg4: memref<1x384xf32, #tpu.memory_space<vmem>>, %arg5: memref<1x16x128xbf16, #tpu.memory_space<vmem>>, %arg6: memref<1x16x128xbf16, #tpu.memory_space<vmem>>, %arg7: memref<1x16x128xbf16, #tpu.memory_space<vmem>>) attributes {dimension_semantics = [#tpu.dimension_semantics<parallel>, #tpu.dimension_semantics<parallel>], iteration_bounds = array<i64: 2, 1>, scalar_prefetch = 0 : i64, scratch_operands = 0 : i64, tpu.core_type = #tpu.core_type<tc>, window_params = [{transform_indices = @transform_0, window_bounds = array<i64: 1, 16, 128>}, {pipeline_mode = #tpu.pipeline_mode<synchronous>, transform_indices = @transform_1, window_bounds = array<i64: 128, 384>}, {pipeline_mode = #tpu.pipeline_mode<synchronous>, transform_indices = @transform_2, window_bounds = array<i64: 1, 384>}, {transform_indices = @transform_3, window_bounds = array<i64: 1, 16, 128>}, {transform_indices = @transform_4, window_bounds = array<i64: 1, 16, 128>}, {transform_indices = @transform_5, window_bounds = array<i64: 1, 16, 128>}]} {
    %c0 = arith.constant 0 : index
    %c0_0 = arith.constant 0 : index
    %c0_1 = arith.constant 0 : index
    %0 = vector.load %arg2[%c0, %c0_0, %c0_1] : memref<1x16x128xbf16, #tpu.memory_space<vmem>>, vector<1x16x128xbf16>
    %1 = vector.shape_cast %0 : vector<1x16x128xbf16> to vector<16x128xbf16>
    %c0_2 = arith.constant 0 : index
    %c0_3 = arith.constant 0 : index
    %2 = vector.load %arg3[%c0_2, %c0_3] : memref<128x384xbf16, #tpu.memory_space<vmem>>, vector<128x384xbf16>
    %cst = arith.constant dense<0.000000e+00> : vector<16x384xf32>
    %3 = tpu.matmul %1, %2, %cst {dimension_numbers = #tpu.dot_dimension_numbers<[1], [0], [0], [1], [0, 0, 1, 1], [], []>} : vector<16x128xbf16>, vector<128x384xbf16>, vector<16x384xf32> -> vector<16x384xf32>
    %c0_4 = arith.constant 0 : index
    %c0_5 = arith.constant 0 : index
    %4 = vector.load %arg4[%c0_4, %c0_5] : memref<1x384xf32, #tpu.memory_space<vmem>>, vector<1x384xf32>
    %5 = vector.broadcast %4 : vector<1x384xf32> to vector<16x384xf32>
    %6 = arith.addf %3, %5 : vector<16x384xf32>
    %7 = arith.truncf %6 : vector<16x384xf32> to vector<16x384xbf16>
    %8 = vector.extract_strided_slice %7 {offsets = [0, 0], sizes = [16, 128], strides = [1, 1]} : vector<16x384xbf16> to vector<16x128xbf16>
    %c0_6 = arith.constant 0 : index
    %c0_7 = arith.constant 0 : index
    %c0_8 = arith.constant 0 : index
    %9 = vector.load %arg5[%c0_6, %c0_7, %c0_8] : memref<1x16x128xbf16, #tpu.memory_space<vmem>>, vector<1x16x128xbf16>
    %10 = vector.shape_cast %9 : vector<1x16x128xbf16> to vector<16x128xbf16>
    %11 = vector.shape_cast %8 : vector<16x128xbf16> to vector<1x16x128xbf16>
    tpu.vector_store %arg5[%c0_6, %c0_7, %c0_8], %11 {strides = array<i32>} : memref<1x16x128xbf16, #tpu.memory_space<vmem>>, vector<1x16x128xbf16>,
    %12 = vector.extract_strided_slice %7 {offsets = [0, 128], sizes = [16, 128], strides = [1, 1]} : vector<16x384xbf16> to vector<16x128xbf16>
    %c0_9 = arith.constant 0 : index
    %c0_10 = arith.constant 0 : index
    %c0_11 = arith.constant 0 : index
    %13 = vector.load %arg6[%c0_9, %c0_10, %c0_11] : memref<1x16x128xbf16, #tpu.memory_space<vmem>>, vector<1x16x128xbf16>
    %14 = vector.shape_cast %13 : vector<1x16x128xbf16> to vector<16x128xbf16>
    %15 = vector.shape_cast %12 : vector<16x128xbf16> to vector<1x16x128xbf16>
    tpu.vector_store %arg6[%c0_9, %c0_10, %c0_11], %15 {strides = array<i32>} : memref<1x16x128xbf16, #tpu.memory_space<vmem>>, vector<1x16x128xbf16>,
    %16 = vector.extract_strided_slice %7 {offsets = [0, 256], sizes = [16, 128], strides = [1, 1]} : vector<16x384xbf16> to vector<16x128xbf16>
    %c0_12 = arith.constant 0 : index
    %c0_13 = arith.constant 0 : index
    %c0_14 = arith.constant 0 : index
    %17 = vector.load %arg7[%c0_12, %c0_13, %c0_14] : memref<1x16x128xbf16, #tpu.memory_space<vmem>>, vector<1x16x128xbf16>
    %18 = vector.shape_cast %17 : vector<1x16x128xbf16> to vector<16x128xbf16>
    %19 = vector.shape_cast %16 : vector<16x128xbf16> to vector<1x16x128xbf16>
    tpu.vector_store %arg7[%c0_12, %c0_13, %c0_14], %19 {strides = array<i32>} : memref<1x16x128xbf16, #tpu.memory_space<vmem>>, vector<1x16x128xbf16>,
    return
  }
  func.func @transform_0(%arg0: i32, %arg1: i32) -> (i32, i32, i32) {
    %c0_i32 = arith.constant 0 : i32
    %c0_i32_0 = arith.constant 0 : i32
    return %arg0, %arg1, %c0_i32 : i32, i32, i32
  }
  func.func @transform_1(%arg0: i32, %arg1: i32) -> (i32, i32) {
    %c0_i32 = arith.constant 0 : i32
    %c0_i32_0 = arith.constant 0 : i32
    %c0_i32_1 = arith.constant 0 : i32
    return %c0_i32, %c0_i32_0 : i32, i32
  }
  func.func @transform_2(%arg0: i32, %arg1: i32) -> (i32, i32) {
    %c0_i32 = arith.constant 0 : i32
    %c0_i32_0 = arith.constant 0 : i32
    %c0_i32_1 = arith.constant 0 : i32
    return %c0_i32, %c0_i32_0 : i32, i32
  }
  func.func @transform_3(%arg0: i32, %arg1: i32) -> (i32, i32, i32) {
    %c0_i32 = arith.constant 0 : i32
    %c0_i32_0 = arith.constant 0 : i32
    return %arg0, %arg1, %c0_i32 : i32, i32, i32
  }
  func.func @transform_4(%arg0: i32, %arg1: i32) -> (i32, i32, i32) {
    %c0_i32 = arith.constant 0 : i32
    %c0_i32_0 = arith.constant 0 : i32
    return %arg0, %arg1, %c0_i32 : i32, i32, i32
  }
  func.func @transform_5(%arg0: i32, %arg1: i32) -> (i32, i32, i32) {
    %c0_i32 = arith.constant 0 : i32
    %c0_i32_0 = arith.constant 0 : i32
    return %arg0, %arg1, %c0_i32 : i32, i32, i32
  }
}

</mosaic_0001>

<bundles_post_ra>
// kernel: tpu_custom_call.1
= control target key start
LH: loop header
LB: loop body
LE: loop exit
PB: predicated region body
PF: predicated region fallthrough
CT: control target
= control target key end

     0   :  { %s1574_s0 = inlined_call_operand.hbm [shape: bf16[2,16,128], index: 0, kind: input, shape index: {}]   ;;  %s1575_s1 = inlined_call_operand.hbm [shape: bf16[128,384], index: 1, kind: input, shape index: {}]   ;;  %s1576_s2 = inlined_call_operand.hbm [shape: f32[1,384], index: 2, kind: input, shape index: {}]   ;;  %s1577_s3 = inlined_call_operand.hbm [shape: bf16[2,16,128], index: 3, kind: output, shape index: {0}]   ;;  %s1578_s4 = inlined_call_operand.hbm [shape: bf16[2,16,128], index: 4, kind: output, shape index: {1}]   ;;  %s1579_s5 = inlined_call_operand.hbm [shape: bf16[2,16,128], index: 5, kind: output, shape index: {2}]  }
   0x1   :  { %1583 = sst [smem:[#allocation18_spill]] %s1574_s0 }
   0x2   :  { %1584 = sst [smem:[#allocation19_spill]] %s1575_s1 }
   0x3   :  { %1585 = sst [smem:[#allocation20_spill]] %s1576_s2 }
   0x4   :  { %11 = vsyncpa [#allocation3], 0 }
   0x5   :  { %13 = vsyncpa [#allocation3 + $0x1], 0 }
   0x6   :  { %14 = vsyncpa [#allocation6], 0 }
   0x7   :  { %15 = vsyncpa [#allocation4], 0 }
   0x8   :  { %17 = vsyncpa [#allocation4 + $0x1], 0 }
   0x9   :  { %18 = vsyncpa [#allocation10], 0 }
   0xa   :  { %20 = vsyncpa [#allocation10 + $0x1], 0  ;;  %s1336_s18 = smov 0   ;;  %s1338_s19 = smov 0  }
   0xb   :  { %s1340_s20 = smov 0   ;;  %s1342_s21 = smov 0  }
   0xc   :  { %s1344_s22 = smov 0   ;;  %s1346_s23 = smov 0  }
   0xd LB: > { %s1367_s24 = sadd.s32 4294967295, %s1296_s23   ;;  %s1580_s25 = sadd.s32 4294967294, %s1296_s23   ;;  %s1296_s23 = sphi %s1346_s23, %s26_s23   ;;  %s1292_s22 = sphi %s1344_s22, %s1605_s22   ;;  %s1288_s21 = sphi %s1342_s21, %s1604_s21   ;;  %s1284_s20 = sphi %s1340_s20, %s1603_s20   ;;  %s1280_s19 = sphi %s1338_s19, %s1602_s19   ;;  %s1276_s18 = sphi %s1336_s18, %s1601_s18  }
   0xe   : > { %p60_p0 = scmp.ne.s32.totalorder %s1280_s19, %s1276_s18  ;;  %p61_p1 = scmp.eq.s32.totalorder %s1367_s24, 0 }
   0xf   : > { %p128_p2 = scmp.eq.s32.totalorder %s1367_s24, 1  ;;  %p134_p3 = scmp.eq.s32.totalorder %s1580_s25, 1 }
  0x10   : > { %p1378_p4 = por %p61_p1, %p60_p0  ;;  %p797_p5 = scmp.ge.s32.totalorder %s1296_s23, 1 }
  0x11   : > { %p1383_p6 = por %p134_p3, %p60_p0  ;;  %p197_p7 = scmp.lt.s32.totalorder %s1296_s23, 3 }
  0x12   : > { %s1588_s1 = sld [smem:[#allocation19_spill]]  ;;  %s1298_s7 = smov [#allocation5]  }
  0x13   : > { %p1391_p8 = pnand %p797_p5, %p197_p7  ;;  %s210_s8 = sshll.u32 %s1298_s7, 4  ;;  %s211_s8 = int_to_ptr.vmem [resolvable:$true] %s210_s8 }
  0x14   : > { %p800_p11 = scmp.ge.s32.totalorder %s1296_s23, 2  ;;  %s1590_s2 = sld [smem:[#allocation20_spill]] }
  0x15   : > { %p977_p9 = pneg %p1391_p8  ;;  %s1299_s12 = smov 192  }
  0x16   : > { %s1300_s13 = smov 12   ;;  %s1301_s14 = smov [#allocation7]  }
  0x17   : > { %p978_p10 = pnand %p977_p9, %p61_p1  ;;  %s225_s15 = sshll.u32 %s1301_s14, 4  ;;  %s226_s15 = int_to_ptr.vmem [resolvable:$true] %s225_s15 }
  0x18   : > { %s208_s30 = sshll.u32 %s1588_s1, 4  ;;  %s38_s16 = sadd.s32 1, %s1292_s22  ;;  %s209_s30 = int_to_ptr.hbm [resolvable:$true] %s208_s30 }
  0x19   : > { %980 = dma.hbm_to_vmem [thread:$0]  (!%p978_p10), %s209_s30, 3072, %s211_s8, [#allocation6], %s1299_s12, %s1299_s12, %s1300_s13  }
  0x1a   : > { %s223_s11 = sshll.u32 %s1590_s2, 4  ;;  %s47_s17 = sadd.s32 1, %s1284_s20  ;;  %s224_s11 = int_to_ptr.hbm [resolvable:$true] %s223_s11 }
  0x1b   : > { %983 = dma.hbm_to_vmem [thread:$0]  (!%p978_p10), %s224_s11, 48, %s226_s15, [#allocation6]  }
  0x1c   : > { %p40_p12 = scmp.ge.s32.totalorder %s38_s16, 2  ;;  %p54_p13 = scmp.ne.s32.totalorder %s1284_s20, %s1280_s19 }
  0x1d   : > { %p55_p0 = scmp.eq.s32.totalorder %s1296_s23, 0  ;;  %p1000_p3 = scmp.lt.s32.totalorder %s1296_s23, 2 }
  0x1e   : > { %s1607_s16 = smov (%p40_p12, %s38_s16), 0  ;;  %p1417_p7 = por %p128_p2, %p54_p13 }
  0x1f   : > { %1591 = sst [smem:[#allocation16_spill]] %s1607_s16  ;;  %p1411_p5 = por %p55_p0, %p54_p13 }
  0x20   : > { %s42_s30 = ssub.s32 %s1292_s22, %s1607_s16  ;;  %s236_s7 = sand.u32 1, %s1284_s20  }
  0x21   : > { %p45_p9 = scmp.eq.s32.totalorder %s42_s30, 0  ;;  %s801_s8 = sshll.u32 %s236_s7, 3 }
  0x22   : > { %s922_s9 = sshll.u32 %s1292_s22, 3  ;;  %s1594_s0 = sld [smem:[#allocation18_spill]] }
  0x23   : > { %s1426_s10 = scalar_select %p45_p9, %s1284_s20, %s47_s17  }
  0x24   : > { %s240_s15 = scalar_lea.vmem [#allocation2], %s801_s8  ;;  %p985_p2 = pnand %p1000_p3, %p1411_p5 }
  0x25   : > { %s250_s25 = sshll.u32 %s240_s15, 4  ;;  %s237_s1 = scalar_lea.sflag [#allocation3], %s236_s7  ;;  %s251_s25 = int_to_ptr.vmem [resolvable:$true] %s250_s25 }
  0x26   : > { %s1302_s2 = smov 64   ;;  %s1303_s16 = smov 4  }
  0x27   : > { %262 = sbr.rel (%p1391_p8) target bundleno = 254 (0xfe), region = 32 }
  0x28   : > { %s247_s13 = scalar_lea.hbm %s1594_s0, %s922_s9 }
  0x29   : > { %s248_s14 = sshll.u32 %s247_s13, 4  ;;  %s249_s14 = int_to_ptr.hbm [resolvable:$true] %s248_s14 }
  0x2a   : > { %987 = dma.hbm_to_vmem [thread:$0]  (!%p985_p2), %s249_s14, 128, %s251_s25, %s237_s1, %s1302_s2, %s1302_s2, %s1303_s16  }
  0x2c   : > { %s1438_s17 = sand.u32 1, %s1280_s19  }
  0x2d   : > { %s1441_s30 = sshll.u32 %s1438_s17, 3  ;;  %s265_s8 = scalar_lea.sflag [#allocation3], %s1438_s17 }
  0x2e   : > { %s268_s28 = scalar_lea.vmem [#allocation2], %s1441_s30 }
  0x2f   : > { %1259 = dma.done.wait (%p1378_p4), %s265_s8, 128  }
  0x30   : > { %1261 = vsyncadd (%p1378_p4), %s265_s8, 4294967168 }
  0x31   : > { %1263 = dma.done.wait (%p61_p1), [#allocation6], 3120  }
  0x32   : > { %1265 = vsyncadd (%p61_p1), [#allocation6], 4294964176  ;;  %v901_v0 = vld [vmem:[#allocation5 + $0xa8] sm:$0xf]  ;;  %v946_v1 = vld [vmem:[#allocation5 + $0xb0] sm:$0xf0] }
  0x33   : > { %v945_v2 = vld [vmem:[#allocation5 + $0xac] sm:$0xf]  ;;  %v902_v3 = vor.u32 %v946_v1, %v901_v0  ;;  %v903_v4 = vld [vmem:[#allocation5 + $0xb4] sm:$0xf0]  ;;  %v909_v5 = vld [vmem:[#allocation5 + $0xb0] sm:$0xf] }
  0x34   : > { %v947_v6 = vld [vmem:[#allocation5 + $0xb8] sm:$0xf0]  ;;  %v906_v7 = vor.u32 %v945_v2, %v903_v4  ;;  %v889_v9 = vld [vmem:[#allocation5 + $0x90] sm:$0xf]  ;;  %v942_v11 = vld [vmem:[#allocation5 + $0x94] sm:$0xf] }
  0x35   : > { %v910_v8 = vor.u32 %v947_v6, %v909_v5  ;;  %v943_v10 = vld [vmem:[#allocation5 + $0x98] sm:$0xf0]  ;;  %496 = vmatpush.bf16.msra.mxu0 %v902_v3  ;;  %v891_v13 = vld [vmem:[#allocation5 + $0x9c] sm:$0xf0]  ;;  %v897_v14 = vld [vmem:[#allocation5 + $0x98] sm:$0xf] }
  0x36   : > { %v890_v12 = vor.u32 %v943_v10, %v889_v9  ;;  %v944_v15 = vld [vmem:[#allocation5 + $0xa0] sm:$0xf0]  ;;  %510 = vmatpush.bf16.msra.mxu1 %v906_v7  ;;  %v894_v16 = vor.u32 %v942_v11, %v891_v13  ;;  %v877_v18 = vld [vmem:[#allocation5 + $0x78] sm:$0xf]  ;;  %v939_v20 = vld [vmem:[#allocation5 + $0x7c] sm:$0xf] }
  0x37   : > { %524 = vmatpush.bf16.msra.mxu2 %v910_v8  ;;  %v898_v17 = vor.u32 %v944_v15, %v897_v14  ;;  %v940_v19 = vld [vmem:[#allocation5 + $0x80] sm:$0xf0]  ;;  %v879_v21 = vld [vmem:[#allocation5 + $0x84] sm:$0xf0]  ;;  %v885_v22 = vld [vmem:[#allocation5 + $0x80] sm:$0xf] }
  0x38   : > { %v941_v23 = vld [vmem:[#allocation5 + $0x88] sm:$0xf0]  ;;  %v878_v24 = vor.u32 %v940_v19, %v877_v18  ;;  %v882_v25 = vor.u32 %v939_v20, %v879_v21  ;;  %v865_v27 = vld [vmem:[#allocation5 + $0x60] sm:$0xf]  ;;  %v936_v29 = vld [vmem:[#allocation5 + $0x64] sm:$0xf] }
  0x39   : > { %497 = vmatpush.bf16.msra.mxu0 %v890_v12  ;;  %v886_v26 = vor.u32 %v941_v23, %v885_v22  ;;  %v937_v28 = vld [vmem:[#allocation5 + $0x68] sm:$0xf0]  ;;  %v867_v30 = vld [vmem:[#allocation5 + $0x6c] sm:$0xf0]  ;;  %v873_v31 = vld [vmem:[#allocation5 + $0x68] sm:$0xf] }
  0x3a   : > { %511 = vmatpush.bf16.msra.mxu1 %v894_v16  ;;  %v938_v32 = vld [vmem:[#allocation5 + $0x70] sm:$0xf0]  ;;  %v866_v33 = vor.u32 %v937_v28, %v865_v27  ;;  %v870_v34 = vor.u32 %v936_v29, %v867_v30  ;;  %v853_v36 = vld [vmem:[#allocation5 + $0x48] sm:$0xf]  ;;  %v933_v38 = vld [vmem:[#allocation5 + $0x4c] sm:$0xf] }
  0x3b   : > { %525 = vmatpush.bf16.msra.mxu2 %v898_v17  ;;  %v874_v35 = vor.u32 %v938_v32, %v873_v31  ;;  %v934_v37 = vld [vmem:[#allocation5 + $0x50] sm:$0xf0]  ;;  %v855_v39 = vld [vmem:[#allocation5 + $0x54] sm:$0xf0]  ;;  %v861_v40 = vld [vmem:[#allocation5 + $0x50] sm:$0xf] }
  0x3c   : > { %v935_v41 = vld [vmem:[#allocation5 + $0x58] sm:$0xf0]  ;;  %v854_v42 = vor.u32 %v934_v37, %v853_v36  ;;  %v858_v43 = vor.u32 %v933_v38, %v855_v39  ;;  %v841_v45 = vld [vmem:[#allocation5 + $0x30] sm:$0xf]  ;;  %v930_v47 = vld [vmem:[#allocation5 + $0x34] sm:$0xf] }
  0x3d   : > { %498 = vmatpush.bf16.msra.mxu0 %v878_v24  ;;  %v862_v44 = vor.u32 %v935_v41, %v861_v40  ;;  %v931_v46 = vld [vmem:[#allocation5 + $0x38] sm:$0xf0]  ;;  %v843_v48 = vld [vmem:[#allocation5 + $0x3c] sm:$0xf0]  ;;  %v849_v49 = vld [vmem:[#allocation5 + $0x38] sm:$0xf] }
  0x3e   : > { %512 = vmatpush.bf16.msra.mxu1 %v882_v25  ;;  %v932_v50 = vld [vmem:[#allocation5 + $0x40] sm:$0xf0]  ;;  %v842_v51 = vor.u32 %v931_v46, %v841_v45  ;;  %v846_v52 = vor.u32 %v930_v47, %v843_v48  ;;  %v829_v54 = vld [vmem:[#allocation5 + $0x18] sm:$0xf]  ;;  %v927_v56 = vld [vmem:[#allocation5 + $0x1c] sm:$0xf] }
  0x3f   : > { %526 = vmatpush.bf16.msra.mxu2 %v886_v26  ;;  %v850_v53 = vor.u32 %v932_v50, %v849_v49  ;;  %v928_v55 = vld [vmem:[#allocation5 + $0x20] sm:$0xf0]  ;;  %v831_v57 = vld [vmem:[#allocation5 + $0x24] sm:$0xf0]  ;;  %v837_v58 = vld [vmem:[#allocation5 + $0x20] sm:$0xf] }
  0x40   : > { %v929_v59 = vld [vmem:[#allocation5 + $0x28] sm:$0xf0]  ;;  %v830_v60 = vor.u32 %v928_v55, %v829_v54  ;;  %v834_v61 = vor.u32 %v927_v56, %v831_v57  ;;  %v817_v63 = vld [vmem:[#allocation5] sm:$0xf]  ;;  %v924_v1 = vld [vmem:[#allocation5 + $0x4] sm:$0xf] }
  0x41   : > { %499 = vmatpush.bf16.msra.mxu0 %v866_v33  ;;  %v838_v62 = vor.u32 %v929_v59, %v837_v58  ;;  %v925_v0 = vld [vmem:[#allocation5 + $0x8] sm:$0xf0]  ;;  %v819_v2 = vld [vmem:[#allocation5 + $0xc] sm:$0xf0]  ;;  %v825_v3 = vld [vmem:[#allocation5 + $0x8] sm:$0xf] }
  0x42   : > { %513 = vmatpush.bf16.msra.mxu1 %v870_v34  ;;  %v926_v4 = vld [vmem:[#allocation5 + $0x10] sm:$0xf0]  ;;  %v818_v5 = vor.u32 %v925_v0, %v817_v63  ;;  %v822_v6 = vor.u32 %v924_v1, %v819_v2  ;;  %v354_v9 = vld [vmem:[#allocation7] sm:$0x7]  ;;  %s1456_s1 = sshll.u32 %s1288_s21, 3  ;;  %s1459_s2 = scalar_lea.vmem [#allocation9], %s1441_s30 }
  0x43   : > { %527 = vmatpush.bf16.msra.mxu2 %v874_v35  ;;  %v826_v7 = vor.u32 %v926_v4, %v825_v3  ;;  %v923_v8 = vld [vmem:[%s268_s28] sm:$0xff]  ;;  %v356_v10 = vperm.slane %v354_v9, 0  ;;  %v357_v11 = vperm.slane %v354_v9, 1  ;;  %s598_s25 = sshll.u32 %s1459_s2, 4  ;;  %s301_s26 = scalar_lea.vmem [#allocation8], %s1441_s30  ;;  %v358_v24 = vperm.slane %v354_v9, 2  ;;  %s1473_s25 = int_to_ptr.vmem [resolvable:$true] %s598_s25 }
  0x44   : > { %s1463_s6 = sshll.u32 %s301_s26, 4  ;;  %s578_s9 = scalar_lea.hbm %s1577_s3, %s1456_s1 }
  0x45   : > { %500 = vmatpush.bf16.msra.mxu0 %v854_v42  ;;  %1595 = sst [smem:[#allocation17_spill]] %s1463_s6  ;;  %s597_s12 = scalar_lea.hbm %s1578_s4, %s1456_s1 }
  0x46   : > { %514 = vmatpush.bf16.msra.mxu1 %v858_v43  ;;  %s1477_s13 = sshll.u32 %s578_s9, 4  ;;  %s1480_s15 = sshll.u32 %s597_s12, 4  ;;  %s582_s13 = int_to_ptr.hbm [resolvable:$true] %s1477_s13  ;;  %s601_s15 = int_to_ptr.hbm [resolvable:$true] %s1480_s15 }
  0x47   : > { %528 = vmatpush.bf16.msra.mxu2 %v862_v44  ;;  %s616_s16 = scalar_lea.hbm %s1579_s5, %s1456_s1  ;;  %s555_s7 = scalar_lea.sflag [#allocation4], %s1438_s17 }
  0x48   : > { %s1164_s9 = sshra.s32 %s582_s13, 4  ;;  %s1170_s14 = scalar_lea.hbm %s1577_s3, 16  ;;  %s1165_s9 = int_to_ptr.hbm [resolvable:$true] %s1164_s9 }
  0x49   : > { %501 = vmatpush.bf16.msra.mxu0 %v842_v51  ;;  %s1166_s21 = scalar_lea.hbm %s1165_s9, 8  ;;  %p1171_p10 = scmp.lt.s32.totalorder %s1165_s9, %s1577_s3 }
  0x4a   : > { %515 = vmatpush.bf16.msra.mxu1 %v846_v52  ;;  %p1167_p1 = scmp.ne.s32.totalorder %s1165_s9, %s1166_s21  ;;  %p1172_p12 = scmp.lt.s32.totalorder %s1170_s14, %s1166_s21 }
  0x4b   : > { %529 = vmatpush.bf16.msra.mxu2 %v850_v53 }
  0x4c   : > { %p1168_p4 = pnand %p1167_p1, %p1417_p7  ;;  %p1173_p13 = por %p1172_p12, %p1171_p10 }
  0x4d   : > { %502 = vmatpush.bf16.msra.mxu0 %v830_v60 }
  0x4e   : > { %516 = vmatpush.bf16.msra.mxu1 %v834_v61  ;;  %p1169_p8 = pneg %p1168_p4 }
  0x4f   : > { %530 = vmatpush.bf16.msra.mxu2 %v838_v62 }
  0x50   : > { %p1174_p0 = pnand %p1173_p13, %p1169_p8 }
  0x51   : > { %503 = vmatpush.bf16.msra.mxu0 %v818_v5 }
  0x52   : > { %517 = vmatpush.bf16.msra.mxu1 %v822_v6 }
  0x53   : > { %531 = vmatpush.bf16.msra.mxu2 %v826_v7 }
  0x54   : > { %504 = vmatmul.bf16.vlgmr.msra.gmra.mxu0 %v923_v8 }
  0x55   : > { %518 = vmatmul.bf16.vlgmr.msra.gmra.mxu1 %v923_v8 }
  0x56   : > { %532 = vmatmul.bf16.vlgmr.msra.gmra.mxu2 %v923_v8 }
  0xd1   : > { %v505_v12 = vpop.f32.mrf.mxu0 }
  0xd2   : > { %v506_v13 = vadd.f32 %v505_v12, %v356_v10  ;;  %v519_v14 = vpop.f32.mrf.mxu1 }
  0xd3   : > { %v520_v15 = vadd.f32 %v519_v14, %v357_v11 }
  0xd5   : > { %v538_v16 = vpack.c.bf16 %v520_v15, %v506_v13 }
  0xd7   : > { %v546_v17 = vrot.slane %v538_v16, 4 }
  0xd9   : > { %v533_v18 = vpop.f32.mrf.mxu2  ;;  %550 = vst [vmem:[%s1459_s2] sm:$0xf] %v546_v17  ;;  %v507_v19 = vpop.f32.mrf.mxu0 }
  0xda   : > { %v508_v20 = vadd.f32 %v507_v19, %v356_v10  ;;  %v521_v21 = vpop.f32.mrf.mxu1 }
  0xdb   : > { %v522_v22 = vadd.f32 %v521_v21, %v357_v11 }
  0xdc   : > { %v954_v23 = vpack.c.bf16 %v508_v20, %v506_v13 }
  0xdd   : > { %v540_v25 = vpack.c.bf16 %v522_v22, %v508_v20 }
  0xde   : > { %955 = vst [vmem:[%s301_s26] sm:$0xff] %v954_v23  }
  0xdf   : > { %v547_v26 = vrot.slane %v540_v25, 4 }
  0xe0   : > { %1177 = shalt.err (!%p1174_p0)
}
  0xe1   : > { %s1304_s17 = smov 64   ;;  %s1596_s1 = sld [smem:[#allocation17_spill]]  ;;  %v535_v27 = vpop.f32.mrf.mxu2  ;;  %v534_v28 = vadd.f32 %v533_v18, %v358_v24  ;;  %551 = vst [vmem:[%s1459_s2 + $0x4] sm:$0xf] %v547_v26 }
  0xe2   : > { %s1305_s26 = smov 4   ;;  %s315_s0 = scalar_lea.vmem [#allocation11], %s1441_s30  ;;  %v536_v29 = vadd.f32 %v535_v27, %v358_v24 }
  0xe3   : > { %s1505_s6 = sshll.u32 %s315_s0, 4  ;;  %s1507_s14 = sshll.u32 %s616_s16, 4  ;;  %s618_s6 = int_to_ptr.vmem [resolvable:$true] %s1505_s6  ;;  %s620_s14 = int_to_ptr.hbm [resolvable:$true] %s1507_s14 }
  0xe4   : > { %s1598_s28 = sand.u32 1, %s1367_s24   ;;  %s1192_s21 = sshra.s32 %s601_s15, 4  ;;  %s1193_s21 = int_to_ptr.hbm [resolvable:$true] %s1192_s21 }
  0xe5   : > { %s1512_s9 = scalar_lea.sflag [#allocation10], %s1598_s28  ;;  %s1194_s11 = scalar_lea.hbm %s1193_s21, 8 }
  0xe6   : > { %p1195_p3 = scmp.ne.s32.totalorder %s1193_s21, %s1194_s11  ;;  %p1199_p2 = scmp.lt.s32.totalorder %s1193_s21, %s1578_s4 }
  0xe7   : > { %s1597_s8 = int_to_ptr.vmem [resolvable:$true] %s1596_s1 }
  0xe8   : > { %971 = dma.vmem_to_hbm [thread:$0]  (%p1417_p7), %s1597_s8, 128, %s582_s13, %s555_s7, %s1304_s17, %s1304_s17, %s1305_s26  }
  0xe9   : > { %p1196_p5 = pnand %p1195_p3, %p1417_p7  ;;  %s1198_s7 = scalar_lea.hbm %s1578_s4, 16 }
  0xea   : > { %p1200_p1 = scmp.lt.s32.totalorder %s1198_s7, %s1194_s11 }
  0xeb   : > { %p1197_p9 = pneg %p1196_p5 }
  0xec   : > { %p1201_p4 = por %p1200_p1, %p1199_p2 }
  0xee   : > { %p1202_p8 = pnand %p1201_p4, %p1197_p9 }
  0xf0   : > { %1205 = shalt.err (!%p1202_p8)
}
  0xf1   : > { %972 = dma.vmem_to_hbm [thread:$0]  (%p1417_p7), %s1473_s25, 128, %s601_s15, %s1512_s9, %s1304_s17, %s1304_s17, %s1305_s26   ;;  %v959_v30 = vpack.c.bf16 %v536_v29, %v534_v28 }
  0xf2   : > { %s1220_s24 = sshra.s32 %s620_s14, 4  ;;  %s1226_s28 = scalar_lea.hbm %s1579_s5, 16  ;;  %s1221_s24 = int_to_ptr.hbm [resolvable:$true] %s1220_s24 }
  0xf3   : > { %960 = vst [vmem:[%s315_s0] sm:$0xff] %v959_v30   ;;  %s1222_s2 = scalar_lea.hbm %s1221_s24, 8  ;;  %p1227_p0 = scmp.lt.s32.totalorder %s1221_s24, %s1579_s5 }
  0xf4   : > { %p1223_p10 = scmp.ne.s32.totalorder %s1221_s24, %s1222_s2  ;;  %p1228_p3 = scmp.lt.s32.totalorder %s1226_s28, %s1222_s2 }
  0xf6   : > { %p1224_p12 = pnand %p1223_p10, %p1417_p7  ;;  %p1229_p5 = por %p1228_p3, %p1227_p0 }
  0xf8   : > { %p1225_p13 = pneg %p1224_p12 }
  0xfa   : > { %p1230_p9 = pnand %p1229_p5, %p1225_p13 }
  0xfc   : > { %1233 = shalt.err (!%p1230_p9)
}
  0xfd   : > { %973 = dma.vmem_to_hbm [thread:$0]  (%p1417_p7), %s618_s6, 128, %s620_s14, %s1512_s9, %s1304_s17, %s1304_s17, %s1305_s26  }
  0xfe PF: > { %s634_s25 = sand.u32 1, %s1276_s18   ;;  %p989_p2 = pnand %p800_p11, %p1383_p6 }
  0xff   : > { %s635_s15 = scalar_lea.sflag [#allocation4], %s634_s25 }
 0x100   : > { %p990_p1 = pneg %p989_p2 }
 0x102   : > { %1267 = dma.done.wait (%p990_p1), %s635_s15, 128  }
 0x103   : > { %1269 = vsyncadd (%p990_p1), %s635_s15, 4294967168  ;;  %s1599_s0 = sadd.s32 4294967294, %s1296_s23  }
 0x104   : > { %s644_s29 = sand.u32 1, %s1599_s0  }
 0x105   : > { %s645_s13 = scalar_lea.sflag [#allocation10], %s644_s29 }
 0x106   : > { %1271 = dma.done.wait (%p990_p1), %s645_s13, 256  }
 0x107   : > { %1273 = vsyncadd (%p990_p1), %s645_s13, 4294967040  ;;  %s26_s23 = sadd.s32 1, %s1296_s23   ;;  %s1600_s27 = sld [smem:[#allocation16_spill]] }
 0x108   : > { %p23_p7 = scmp.ge.s32.totalorder %s26_s23, 4   ;;  %s1601_s18 = smov %s1280_s19 }
 0x109   : > { %s1602_s19 = smov %s1284_s20  ;;  %s1603_s20 = smov %s1426_s10 }
 0x10a   : > { %s1604_s21 = smov %s1292_s22  ;;  %25 = sbr.rel (!%p23_p7) target bundleno = 13 (0xd), region = 117 }
 0x10d   : > { %s1605_s22 = smov %s1600_s27 }
 0x10f   :  { %661 = vsyncpa [#allocation3], 1 }
 0x110   :  { %663 = vsyncpa [#allocation3 + $0x1], 1 }
 0x111   :  { %664 = vsyncpa [#allocation6], 1 }
 0x112   :  { %665 = vsyncpa [#allocation4], 1 }
 0x113   :  { %667 = vsyncpa [#allocation4 + $0x1], 1 }
 0x114   :  { %668 = vsyncpa [#allocation10], 1 }
 0x115   :  { %670 = vsyncpa [#allocation10 + $0x1], 1 }

</bundles_post_ra>
